<compile_context>
chip_gen: v5e
topology: v5e:2x2
jax: 0.10.0
libtpu: 0.0.40
codegen_flags: <defaults>
</compile_context>

<pallas_src>
import math
import numpy as np
import jax
import jax.numpy as jnp
from jax.experimental import pallas as pl
from jax.experimental.pallas import tpu as pltpu

# Direction convention from the reference implementation.
VERTICAL = 0
HORIZONTAL = 1

_LANES = 128
_MAX_PACK_WIDTH = 512  # cap for the lcm(ndecs, 128) lane-dense repack


def _dct_matrix(n: int) -> np.ndarray:
    """Orthonormal DCT-II matrix C such that y = C @ x."""
    k = np.arange(n)[:, None].astype(np.float64)
    m = np.arange(n)[None, :].astype(np.float64)
    C = np.sqrt(2.0 / n) * np.cos(np.pi * (m + 0.5) * k / n)
    C[0, :] *= 1.0 / np.sqrt(2.0)
    return C


def _build_transform(stride) -> np.ndarray:
    """E such that out_block = E @ vec_rowmajor(block) reproduces the
    [cee, coo, coe, ceo] ordering of the orthonormal 2-D block DCT."""
    sv, sh = stride
    G = np.kron(_dct_matrix(sv), _dct_matrix(sh))  # vec(Cv@B@Ch^T) = G@vec(B)
    perm = []
    for pi, pj in ((0, 0), (1, 1), (1, 0), (0, 1)):  # cee, coo, coe, ceo
        for i in range(pi, sv, 2):
            for j in range(pj, sh, 2):
                perm.append(i * sh + j)
    return G[np.array(perm), :]


def _vmem_plan():
    """Per-generation (per input+output buffer-pair byte budget, scoped vmem limit)."""
    cap = None
    try:
        cap = getattr(pltpu.get_tpu_info(), "vmem_capacity_bytes", None)
    except Exception:
        cap = None
    kind = ""
    try:
        kind = jax.devices()[0].device_kind.lower()
    except Exception:
        pass
    if cap is not None and cap <= 80 * 1024 * 1024:
        # v7x: 64 MiB VMEM per TC -> ~16 MiB in+out per buffer pair,
        # ~32 MiB double-buffered; 44 MiB scoped limit leaves headroom.
        return 16 * 1024 * 1024, 44 * 1024 * 1024
    if "v6" in kind:
        # v6e: 128 MiB physical VMEM, 1.4 TB/s HBM -> bigger tiles are free.
        return 32 * 1024 * 1024, 80 * 1024 * 1024
    # v5e / unknown: conservative, legal on every generation.
    return 8 * 1024 * 1024, 32 * 1024 * 1024


def _round_down8(v):
    return max(8, (int(v) // 8) * 8)


def _block_dct_kernel(x_ref, et_ref, o_ref):
    # Strictly row-local: every output row depends only on the same input
    # row, so the masked partial trailing grid tile is safe (padded garbage
    # rows never mix into valid rows).  Do NOT add cross-row reductions here.
    x = x_ref[...]
    if x.dtype != et_ref.dtype:        # static (trace-time) branch
        x = x.astype(et_ref.dtype)
    o_ref[...] = jnp.dot(
        x, et_ref[...], preferred_element_type=jnp.float32
    ).astype(o_ref.dtype)


def nsolt_block_dct2d(x, decimation_factor, number_of_components=1,
                      tile_rows=None):
    sv = int(decimation_factor[VERTICAL])
    sh = int(decimation_factor[HORIZONTAL])
    nS, nC, H, W = x.shape
    assert H % sv == 0 and W % sh == 0, (
        "spatial dims must be divisible by the decimation factor")
    nrows, ncols = H // sv, W // sh
    ndecs = sv * sh

    # ---- lane-dense packing: `pack` consecutive blocks per kernel row ------
    if _LANES % ndecs == 0:
        width = _LANES
    else:
        lcm = math.lcm(ndecs, _LANES)
        if lcm <= _MAX_PACK_WIDTH:
            width = lcm
        else:
            # TODO(synk): very large / odd ndecs falls back to a partial-lane
            # width (masked stores); correctness is unaffected.
            width = ndecs * max(1, _LANES // ndecs)
    pack = width // ndecs

    # ---- transform matrices (bf16 E^T for bf16 inputs, f32 otherwise) ------
    et_dtype = jnp.bfloat16 if x.dtype == jnp.bfloat16 else jnp.float32
    et_itemsize = 2 if et_dtype == jnp.bfloat16 else 4
    Et_small_np = _build_transform((sv, sh)).T                 # (ndecs, ndecs)
    ET_small = jnp.asarray(Et_small_np, dtype=et_dtype)
    ET = jnp.asarray(np.kron(np.eye(pack), Et_small_np), dtype=et_dtype)

    # ---- flatten exactly like X.view([-1, sv, sh]) in the reference --------
    flat = x.reshape(-1)
    T = flat.shape[0]
    R = T // width                      # full lane-dense rows
    rem = T - R * width                 # ragged tail (multiple of ndecs)

    parts = []
    if R > 0:
        main = flat[: R * width].reshape(R, width)

        budget, vmem_limit = _vmem_plan()
        itemsize = x.dtype.itemsize
        row_bytes = width * itemsize * 2            # input + output block rows
        if tile_rows is None:
            tile_rows = budget // row_bytes
        tile_rows = _round_down8(tile_rows)

        if R <= 8:
            tr = R                      # block == full array dims: always legal
        else:
            # >= 2 grid steps so megacore sharding / pipelining have work.
            half_up = -(-((R + 1) // 2) // 8) * 8   # round_up(ceil(R/2), 8)
            tr = min(tile_rows, half_up)            # both multiples of 8, >= 8
        grid = (pl.cdiv(R, tr),)

        cost = pl.CostEstimate(
            flops=2 * R * width * width,
            transcendentals=0,
            bytes_accessed=2 * R * width * itemsize + width * width * et_itemsize,
        )

        out_main = pl.pallas_call(
            _block_dct_kernel,
            out_shape=jax.ShapeDtypeStruct((R, width), x.dtype),
            grid_spec=pltpu.PrefetchScalarGridSpec(
                num_scalar_prefetch=0,
                grid=grid,
                in_specs=[
                    pl.BlockSpec((tr, width), lambda i: (i, 0)),
                    pl.BlockSpec((width, width), lambda i: (0, 0)),  # resident E^T
                ],
                out_specs=pl.BlockSpec((tr, width), lambda i: (i, 0)),
            ),
            compiler_params=pltpu.CompilerParams(
                dimension_semantics=("parallel",),   # rows independent -> megacore OK
                vmem_limit_bytes=vmem_limit,
            ),
            cost_estimate=cost,
        )(main, ET)
        parts.append(out_main.reshape(-1, ndecs))

    if rem > 0:
        # Ragged tail (< width elements): tiny pure-JAX matmul, no full-tensor pad.
        tail = flat[R * width:].reshape(-1, ndecs)
        tail_out = jnp.dot(
            tail.astype(et_dtype), ET_small,
            preferred_element_type=jnp.float32).astype(x.dtype)
        parts.append(tail_out)

    A = parts[0] if len(parts) == 1 else jnp.concatenate(parts, axis=0)
    Z = A.reshape(nS, number_of_components, nrows, ncols, ndecs)
    if number_of_components < 2:
        return jnp.squeeze(Z, axis=1)
    return tuple(jnp.squeeze(z, axis=1)
                 for z in jnp.split(Z, number_of_components, axis=1))


def _reference(x, decimation_factor, number_of_components=1):
    """Pure-JAX re-implementation of the PyTorch forward for verification."""
    sv = decimation_factor[VERTICAL]
    sh = decimation_factor[HORIZONTAL]
    nS, nC, H, W = x.shape
    nrows, ncols = H // sv, W // sh
    ndecs = sv * sh
    Cv = jnp.asarray(_dct_matrix(sv), jnp.float32)
    Ch = jnp.asarray(_dct_matrix(sh), jnp.float32)
    B = x.astype(jnp.float32).reshape(-1, sv, sh)
    Y = jnp.einsum("ip,bpq,jq->bij", Cv, B, Ch)
    cee = Y[:, 0::2, 0::2].reshape(Y.shape[0], -1)
    coo = Y[:, 1::2, 1::2].reshape(Y.shape[0], -1)
    coe = Y[:, 1::2, 0::2].reshape(Y.shape[0], -1)
    ceo = Y[:, 0::2, 1::2].reshape(Y.shape[0], -1)
    A = jnp.concatenate((cee, coo, coe, ceo), axis=-1)
    Z = A.reshape(nS, number_of_components, nrows, ncols, ndecs)
    if number_of_components < 2:
        return jnp.squeeze(Z, axis=1)
    return tuple(jnp.squeeze(z, axis=1)
                 for z in jnp.split(Z, number_of_components, axis=1))


if __name__ == "__main__":
    decimation_factor = [2, 2]          # [vertical, horizontal]
    key = jax.random.PRNGKey(0)

    # Primary small test (matches the module's documented layout).
    x = jax.random.normal(key, (2, 1, 16, 16), dtype=jnp.float32)
    out = jax.block_until_ready(nsolt_block_dct2d(x, decimation_factor, 1))
    ref = _reference(x, decimation_factor, 1)
    assert out.shape == (2, 8, 8, 4), out.shape
    np.testing.assert_allclose(np.asarray(out), np.asarray(ref),
                               rtol=1e-4, atol=1e-4)

    # Multi-step grid (R = 256 rows -> >= 2 grid steps, pipelined).
    x2 = jax.random.normal(jax.random.PRNGKey(1), (2, 1, 128, 128),
                           dtype=jnp.float32)
    out2 = jax.block_until_ready(nsolt_block_dct2d(x2, decimation_factor, 1))
    ref2 = _reference(x2, decimation_factor, 1)
    np.testing.assert_allclose(np.asarray(out2), np.asarray(ref2),
                               rtol=1e-4, atol=1e-4)

    # Ragged tail: T = 324 is not a multiple of 128 -> kernel on the full
    # lane-dense rows plus a pure-JAX tail (no full-tensor pad).
    x3 = jax.random.normal(jax.random.PRNGKey(2), (1, 1, 18, 18),
                           dtype=jnp.float32)
    out3 = jax.block_until_ready(nsolt_block_dct2d(x3, decimation_factor, 1))
    ref3 = _reference(x3, decimation_factor, 1)
    assert out3.shape == (1, 9, 9, 4), out3.shape
    np.testing.assert_allclose(np.asarray(out3), np.asarray(ref3),
                               rtol=1e-4, atol=1e-4)

    # bf16 path (bf16 E^T, native bf16 MXU dot, f32 accumulate).
    xb = x.astype(jnp.bfloat16)
    outb = jax.block_until_ready(nsolt_block_dct2d(xb, decimation_factor, 1))
    refb = _reference(xb, decimation_factor, 1)
    np.testing.assert_allclose(np.asarray(outb.astype(jnp.float32)),
                               np.asarray(refb), rtol=3e-2, atol=3e-2)

    print("KERNEL_OK")
</pallas_src>

<mosaic_0001>
module attributes {stable_mosaic.version = 11 : i64} {
  func.func @_block_dct_kernel(%arg0: i32, %arg1: memref<4x128xf32, #tpu.memory_space<vmem>>, %arg2: memref<128x128xf32, #tpu.memory_space<vmem>>, %arg3: memref<4x128xf32, #tpu.memory_space<vmem>>) attributes {dimension_semantics = [#tpu.dimension_semantics<parallel>], iteration_bounds = array<i64: 1>, scalar_prefetch = 0 : i64, scratch_operands = 0 : i64, tpu.core_type = #tpu.core_type<tc>, window_params = [{transform_indices = @transform_0, window_bounds = array<i64: 4, 128>}, {pipeline_mode = #tpu.pipeline_mode<synchronous>, transform_indices = @transform_1, window_bounds = array<i64: 128, 128>}, {transform_indices = @transform_2, window_bounds = array<i64: 4, 128>}]} {
    %c0 = arith.constant 0 : index
    %c0_0 = arith.constant 0 : index
    %0 = vector.load %arg1[%c0, %c0_0] : memref<4x128xf32, #tpu.memory_space<vmem>>, vector<4x128xf32>
    %c0_1 = arith.constant 0 : index
    %c0_2 = arith.constant 0 : index
    %1 = vector.load %arg2[%c0_1, %c0_2] : memref<128x128xf32, #tpu.memory_space<vmem>>, vector<128x128xf32>
    %cst = arith.constant dense<0.000000e+00> : vector<4x128xf32>
    %2 = tpu.matmul %0, %1, %cst {dimension_numbers = #tpu.dot_dimension_numbers<[1], [0], [0], [1], [0, 0, 1, 1], [], []>} : vector<4x128xf32>, vector<128x128xf32>, vector<4x128xf32> -> vector<4x128xf32>
    %c0_3 = arith.constant 0 : index
    %c0_4 = arith.constant 0 : index
    %3 = vector.load %arg3[%c0_3, %c0_4] : memref<4x128xf32, #tpu.memory_space<vmem>>, vector<4x128xf32>
    tpu.vector_store %arg3[%c0_3, %c0_4], %2 {strides = array<i32>} : memref<4x128xf32, #tpu.memory_space<vmem>>, vector<4x128xf32>,
    return
  }
  func.func @transform_0(%arg0: i32) -> (i32, i32) {
    %c0_i32 = arith.constant 0 : i32
    %c0_i32_0 = arith.constant 0 : i32
    return %arg0, %c0_i32 : i32, i32
  }
  func.func @transform_1(%arg0: i32) -> (i32, i32) {
    %c0_i32 = arith.constant 0 : i32
    %c0_i32_0 = arith.constant 0 : i32
    %c0_i32_1 = arith.constant 0 : i32
    return %c0_i32, %c0_i32_0 : i32, i32
  }
  func.func @transform_2(%arg0: i32) -> (i32, i32) {
    %c0_i32 = arith.constant 0 : i32
    %c0_i32_0 = arith.constant 0 : i32
    return %arg0, %c0_i32 : i32, i32
  }
}

</mosaic_0001>

<bundles_post_ra>
// kernel: tpu_custom_call.1
= control target key start
LH: loop header
LB: loop body
LE: loop exit
PB: predicated region body
PF: predicated region fallthrough
CT: control target
= control target key end

     0   :  { %7 = vsyncpa [#allocation3], 0  ;;  %s210_s0 = inlined_call_operand.hbm [shape: f32[4,128], index: 0, kind: input, shape index: {}]   ;;  %s211_s1 = inlined_call_operand.hbm [shape: f32[128,128], index: 1, kind: input, shape index: {}]   ;;  %s212_s2 = inlined_call_operand.hbm [shape: f32[4,128], index: 2, kind: output, shape index: {}]  }
   0x1   :  { %8 = vsyncpa [#allocation6], 0 }
   0x2   :  { %9 = vsyncpa [#allocation4], 0  ;;  %s15_s11 = sshll.u32 %s210_s0, 4  ;;  %s181_s12 = smov [#allocation2]   ;;  %s16_s11 = int_to_ptr.hbm [resolvable:$true] %s15_s11 }
   0x3   :  { %s17_s13 = sshll.u32 %s181_s12, 4  ;;  %s25_s16 = sshll.u32 %s211_s1, 4  ;;  %s18_s13 = int_to_ptr.vmem [resolvable:$true] %s17_s13  ;;  %s26_s16 = int_to_ptr.hbm [resolvable:$true] %s25_s16 }
   0x4   :  { %20 = dma.hbm_to_vmem [thread:$0]  %s16_s11, 64, %s18_s13, [#allocation3]  }
   0x5   :  { %s182_s17 = smov [#allocation5]   ;;  %s183_s19 = smov 128  }
   0x6   :  { %s27_s18 = sshll.u32 %s182_s17, 4  ;;  %s184_s20 = smov 8   ;;  %s28_s18 = int_to_ptr.vmem [resolvable:$true] %s27_s18 }
   0x7   :  { %33 = dma.hbm_to_vmem [thread:$0]  %s26_s16, 2048, %s28_s18, [#allocation6], %s183_s19, %s183_s19, %s184_s20  }
   0x8   :  { %175 = dma.done.wait [#allocation3], 64  }
   0x9   :  { %176 = vsyncadd [#allocation3], 4294967232 }
   0xa   :  { %177 = dma.done.wait [#allocation6], 2048  }
   0xb   :  { %178 = vsyncadd [#allocation6], 4294965248  ;;  %v58_v0 = vld [vmem:[#allocation5 + $0x78] sm:$0xff]  ;;  %v57_v1 = vld [vmem:[#allocation5 + $0x70] sm:$0xff]  ;;  %s185_s0 = smov [#allocation7]   ;;  %s87_s23 = sshll.u32 %s212_s2, 4  ;;  %s88_s23 = int_to_ptr.hbm [resolvable:$true] %s87_s23 }
   0xc   :  { %59 = vmatpush.msra.mxu0 %v58_v0  ;;  %v56_v2 = vld [vmem:[#allocation5 + $0x68] sm:$0xff]  ;;  %v55_v3 = vld [vmem:[#allocation5 + $0x60] sm:$0xff]  ;;  %v54_v4 = vld [vmem:[#allocation5 + $0x58] sm:$0xff]  ;;  %s85_s1 = sshll.u32 %s185_s0, 4  ;;  %s86_s1 = int_to_ptr.vmem [resolvable:$true] %s85_s1 }
   0xd   :  { %v53_v5 = vld [vmem:[#allocation5 + $0x50] sm:$0xff]  ;;  %v52_v6 = vld [vmem:[#allocation5 + $0x48] sm:$0xff]  ;;  %v51_v7 = vld [vmem:[#allocation5 + $0x40] sm:$0xff] }
   0xe   :  { %60 = vmatpush.msra.mxu0 %v57_v1  ;;  %v50_v8 = vld [vmem:[#allocation5 + $0x38] sm:$0xff]  ;;  %v49_v9 = vld [vmem:[#allocation5 + $0x30] sm:$0xff]  ;;  %v48_v10 = vld [vmem:[#allocation5 + $0x28] sm:$0xff] }
   0xf   :  { %v47_v11 = vld [vmem:[#allocation5 + $0x20] sm:$0xff]  ;;  %v46_v12 = vld [vmem:[#allocation5 + $0x18] sm:$0xff]  ;;  %v45_v13 = vld [vmem:[#allocation5 + $0x10] sm:$0xff] }
  0x10   :  { %61 = vmatpush.msra.mxu0 %v56_v2  ;;  %v44_v14 = vld [vmem:[#allocation5 + $0x8] sm:$0xff]  ;;  %v43_v15 = vld [vmem:[#allocation5] sm:$0xff]  ;;  %v42_v16 = vld [vmem:[#allocation2] sm:$0xf] }
  0x12   :  { %62 = vmatpush.msra.mxu0 %v55_v3 }
  0x14   :  { %63 = vmatpush.msra.mxu0 %v54_v4 }
  0x16   :  { %64 = vmatpush.msra.mxu0 %v53_v5 }
  0x18   :  { %65 = vmatpush.msra.mxu0 %v52_v6 }
  0x1a   :  { %66 = vmatpush.msra.mxu0 %v51_v7 }
  0x1c   :  { %67 = vmatpush.msra.mxu0 %v50_v8 }
  0x1e   :  { %68 = vmatpush.msra.mxu0 %v49_v9 }
  0x20   :  { %69 = vmatpush.msra.mxu0 %v48_v10 }
  0x22   :  { %70 = vmatpush.msra.mxu0 %v47_v11 }
  0x24   :  { %71 = vmatpush.msra.mxu0 %v46_v12 }
  0x26   :  { %72 = vmatpush.msra.mxu0 %v45_v13 }
  0x28   :  { %73 = vmatpush.msra.mxu0 %v44_v14 }
  0x2a   :  { %74 = vmatpush.msra.mxu0 %v43_v15 }
  0x2b   :  { %75 = vmatmul.f32.vlgmr.msra.gmra.mxu0 %v42_v16 }
  0xa8   :  { %v76_v17 = vpop.f32.mrf.mxu0 }
  0xa9   :  { %79 = vst [vmem:[#allocation7] sm:$0xf] %v76_v17 }
  0xaa   :  { %90 = dma.vmem_to_hbm [thread:$0]  %s86_s1, 64, %s88_s23, [#allocation4]  }
  0xab   :  { %179 = dma.done.wait [#allocation4], 64  }
  0xac   :  { %180 = vsyncadd [#allocation4], 4294967232 }
  0xad   :  { %95 = vsyncpa [#allocation3], 1 }
  0xae   :  { %96 = vsyncpa [#allocation6], 1 }
  0xaf   :  { %97 = vsyncpa [#allocation4], 1 }

</bundles_post_ra>
